<compile_context>
chip_gen: v6e
topology: v6e:2x2x1
jax: 0.10.0
libtpu: 0.0.40
codegen_flags: <defaults>
</compile_context>

<pallas_src>
import functools

import jax
import jax.numpy as jnp
from jax import lax
from jax.experimental import pallas as pl
from jax.experimental.pallas import tpu as pltpu

EPS = 1e-5  # nn.InstanceNorm2d default eps
_PARALLEL = pltpu.CompilerParams(dimension_semantics=("parallel",))


# ---------------------------------------------------------------------------
# In-kernel helpers
# ---------------------------------------------------------------------------
def _instance_norm(t):
    """InstanceNorm over the spatial axis (axis 0) of an (N, C) tile; biased variance."""
    mean = jnp.mean(t, axis=0, keepdims=True)
    cen = t - mean
    var = jnp.mean(cen * cen, axis=0, keepdims=True)
    return cen * lax.rsqrt(var + EPS)


def _masked_instance_norm(t, maskf, n_valid):
    """InstanceNorm over the rows of `t` where maskf == 1 (n_valid valid rows)."""
    inv_n = 1.0 / float(n_valid)
    mean = jnp.sum(t * maskf, axis=0, keepdims=True) * inv_n
    cen = (t - mean) * maskf
    var = jnp.sum(cen * cen, axis=0, keepdims=True) * inv_n
    return (t - mean) * lax.rsqrt(var + EPS)


def _flash_attention(x_qk, x_v, wqk_ref, bqk_ref, wv_ref, bv_ref, *, cq, kv_chunk):
    """softmax((x_qk Wq)(x_qk Wk)^T) @ (x_v Wv) via online softmax over KV chunks.

    MXU operands are bf16; accumulation and softmax statistics stay in f32.
    """
    n = x_qk.shape[0]
    qk = jnp.dot(x_qk.astype(jnp.bfloat16), wqk_ref[...],
                 preferred_element_type=jnp.float32) + bqk_ref[...]        # (N, 2Cq)
    v = jnp.dot(x_v.astype(jnp.bfloat16), wv_ref[...],
                preferred_element_type=jnp.float32) + bv_ref[...]          # (N, C)
    q = qk[:, :cq].astype(jnp.bfloat16)
    k = qk[:, cq:].astype(jnp.bfloat16)
    v_b = v.astype(jnp.bfloat16)

    m = jnp.full((n, 1), -jnp.inf, dtype=jnp.float32)
    l = jnp.zeros((n, 1), dtype=jnp.float32)
    acc = jnp.zeros((n, v.shape[1]), dtype=jnp.float32)
    for j in range(n // kv_chunk):                                         # static trip count
        k_j = k[j * kv_chunk:(j + 1) * kv_chunk]
        v_j = v_b[j * kv_chunk:(j + 1) * kv_chunk]
        # contraction on the last axis of both operands: no materialized k.T
        e = lax.dot_general(q, k_j, dimension_numbers=(((1,), (1,)), ((), ())),
                            preferred_element_type=jnp.float32)            # (N, kv_chunk)
        m_new = jnp.maximum(m, jnp.max(e, axis=-1, keepdims=True))
        alpha = jnp.exp(m - m_new)
        p = jnp.exp(e - m_new)
        l = alpha * l + jnp.sum(p, axis=-1, keepdims=True)
        acc = alpha * acc + jnp.dot(p.astype(jnp.bfloat16), v_j,
                                    preferred_element_type=jnp.float32)
        m = m_new
    return acc * pl.reciprocal(l, approx=True)


# ---------------------------------------------------------------------------
# Pallas kernels (one batch element per grid step)
# ---------------------------------------------------------------------------
def _self_attn_in_kernel(x_ref, wqk_ref, bqk_ref, wv_ref, bv_ref, gamma_ref, o_ref,
                         *, cq, kv_chunk):
    """out = InstanceNorm(gamma * SelfAttn(x) + x); x is read once and reused."""
    x = x_ref[0]                                                           # (N, C)
    attn = _flash_attention(x, x, wqk_ref, bqk_ref, wv_ref, bv_ref,
                            cq=cq, kv_chunk=kv_chunk)
    o_ref[0] = _instance_norm(gamma_ref[0, 0] * attn + x)


def _cross_attn_in_kernel(qk_ref, v_ref, res_ref, wqk_ref, bqk_ref, wv_ref, bv_ref,
                          gamma_ref, o_ref, *, cq, kv_chunk):
    """out = IN(IN(gamma * Attn(q,k from qk_src; v from v_src) + res) + v_src)."""
    x_qk = qk_ref[0]
    x_v = v_ref[0]                                                         # out3: V source AND in5 residual
    attn = _flash_attention(x_qk, x_v, wqk_ref, bqk_ref, wv_ref, bv_ref,
                            cq=cq, kv_chunk=kv_chunk)
    t = _instance_norm(gamma_ref[0, 0] * attn + res_ref[0])                # in4
    o_ref[0] = _instance_norm(t + x_v)                                     # in5


def _conv3x3_res_in_kernel(xf_ref, w_ref, b_ref, mask_ref, o_ref, *, H, W):
    """out = InstanceNorm(x + Conv3x3(x)) on a flattened zero-padded (H+2)x(W+2) tile.

    The padded input is read from HBM exactly once; the nine taps are shifted slices
    of the resident tile accumulated through nine MXU matmuls.  Rows whose flattened
    index falls in the padding columns are garbage: the norm statistics mask them out
    and the wrapper crops them.
    """
    Wp = W + 2
    L = H * Wp - 2
    xf = xf_ref[0]                                                         # ((H+2)*Wp, C)
    maskf = mask_ref[...]                                                  # (L, 1)
    acc = jnp.zeros((L, w_ref.shape[-1]), dtype=jnp.float32)
    for ky in range(3):
        for kx in range(3):
            off = ky * Wp + kx
            win = xf[off:off + L, :].astype(jnp.bfloat16)                  # (L, C)
            acc = acc + jnp.dot(win, w_ref[ky * 3 + kx],
                                preferred_element_type=jnp.float32)
    res = xf[Wp + 1:Wp + 1 + L, :]                                         # original x rows
    t = acc + b_ref[...] + res
    o_ref[0] = _masked_instance_norm(t, maskf, H * W)


# ---------------------------------------------------------------------------
# Pallas wrappers
# ---------------------------------------------------------------------------
def _full_spec(shape):
    return pl.BlockSpec(shape, lambda b: (0,) * len(shape))


def _pack_attn_weights(wq, bq, wk, bk, wv, bv, gamma):
    wqk = jnp.concatenate([wq, wk], axis=1).astype(jnp.bfloat16)           # (C, 2Cq)
    bqk = jnp.concatenate([bq, bk], axis=1).astype(jnp.float32)            # (1, 2Cq)
    gamma2 = jnp.reshape(jnp.asarray(gamma, jnp.float32), (1, 1))
    return wqk, bqk, wv.astype(jnp.bfloat16), bv.astype(jnp.float32), gamma2


def _resolve_kv_chunk(n, kv_chunk):
    if kv_chunk is None or kv_chunk <= 0 or n % kv_chunk != 0:
        return n
    return kv_chunk


def self_attention_in(x_nc, *, wq, bq, wk, bk, wv, bv, gamma, kv_chunk=None):
    """Fused Self_Attn + InstanceNorm: IN(gamma * attn(x) + x)."""
    B, N, C = x_nc.shape
    Cq = wq.shape[1]
    kv_chunk = _resolve_kv_chunk(N, kv_chunk)
    wqk, bqk, wv_b, bv_f, g = _pack_attn_weights(wq, bq, wk, bk, wv, bv, gamma)
    kernel = functools.partial(_self_attn_in_kernel, cq=Cq, kv_chunk=kv_chunk)
    feat = pl.BlockSpec((1, N, C), lambda b: (b, 0, 0))
    return pl.pallas_call(
        kernel,
        out_shape=jax.ShapeDtypeStruct((B, N, C), jnp.float32),
        grid=(B,),
        in_specs=[feat,
                  _full_spec((C, 2 * Cq)), _full_spec((1, 2 * Cq)),
                  _full_spec((C, C)), _full_spec((1, C)),
                  pl.BlockSpec(memory_space=pltpu.MemorySpace.SMEM)],       # gamma scalar
        out_specs=pl.BlockSpec((1, N, C), lambda b: (b, 0, 0)),
        compiler_params=_PARALLEL,
    )(x_nc, wqk, bqk, wv_b, bv_f, g)


def cross_attention_in(qk_src, v_src, res, *, wq, bq, wk, bk, wv, bv, gamma,
                       kv_chunk=None):
    """Fused top attention + in4 + in5: IN(IN(gamma*attn + res) + v_src)."""
    B, N, C = qk_src.shape
    Cq = wq.shape[1]
    kv_chunk = _resolve_kv_chunk(N, kv_chunk)
    wqk, bqk, wv_b, bv_f, g = _pack_attn_weights(wq, bq, wk, bk, wv, bv, gamma)
    kernel = functools.partial(_cross_attn_in_kernel, cq=Cq, kv_chunk=kv_chunk)
    feat = lambda: pl.BlockSpec((1, N, C), lambda b: (b, 0, 0))
    return pl.pallas_call(
        kernel,
        out_shape=jax.ShapeDtypeStruct((B, N, C), jnp.float32),
        grid=(B,),
        in_specs=[feat(), feat(), feat(),
                  _full_spec((C, 2 * Cq)), _full_spec((1, 2 * Cq)),
                  _full_spec((C, C)), _full_spec((1, C)),
                  pl.BlockSpec(memory_space=pltpu.MemorySpace.SMEM)],       # gamma scalar
        out_specs=pl.BlockSpec((1, N, C), lambda b: (b, 0, 0)),
        compiler_params=_PARALLEL,
    )(qk_src, v_src, res, wqk, bqk, wv_b, bv_f, g)


def conv3x3_residual_in(x_nc, w_hwio, b, H, W):
    """Fused IN(x + conv3x3(x)) (stride 1, padding 1): padded input read once per batch."""
    B, N, C = x_nc.shape
    Cout = w_hwio.shape[-1]
    Wp = W + 2
    Np = (H + 2) * Wp
    L = H * Wp - 2
    xp = jnp.pad(x_nc.reshape(B, H, W, C), ((0, 0), (1, 1), (1, 1), (0, 0)))
    xf = xp.reshape(B, Np, C)
    w9 = w_hwio.reshape(9, C, Cout).astype(jnp.bfloat16)
    b2 = b.reshape(1, Cout).astype(jnp.float32)
    rel = jnp.arange(L)
    maskf = ((rel % Wp) < W).astype(jnp.float32).reshape(L, 1)             # valid-row mask
    kernel = functools.partial(_conv3x3_res_in_kernel, H=H, W=W)
    out_slab = pl.pallas_call(
        kernel,
        out_shape=jax.ShapeDtypeStruct((B, L, Cout), jnp.float32),
        grid=(B,),
        in_specs=[pl.BlockSpec((1, Np, C), lambda i: (i, 0, 0)),
                  _full_spec((9, C, Cout)),
                  _full_spec((1, Cout)),
                  _full_spec((L, 1))],
        out_specs=pl.BlockSpec((1, L, Cout), lambda i: (i, 0, 0)),
        compiler_params=_PARALLEL,
    )(xf, w9, b2, maskf)
    # crop the valid rows (rel = h*Wp + w with w < W) back to (B, N, Cout)
    out_pad = jnp.pad(out_slab, ((0, 0), (0, 2), (0, 0)))                  # (B, H*Wp, Cout)
    return out_pad.reshape(B, H, Wp, Cout)[:, :, :W, :].reshape(B, N, Cout)


# ---------------------------------------------------------------------------
# Trans_Attn forward (Pallas version)
# ---------------------------------------------------------------------------
def trans_attn_forward(x, y, params, H, W, *, kv_chunk=None):
    B, C = x.shape[0], x.shape[1]
    x_nc = jnp.transpose(x, (0, 2, 3, 1)).reshape(B, H * W, C)
    y_nc = jnp.transpose(y, (0, 2, 3, 1)).reshape(B, H * W, C)

    out1 = self_attention_in(x_nc, kv_chunk=kv_chunk, **params['sa1'])         # sa1 + in1
    out2 = conv3x3_residual_in(out1, params['conv1_w'], params['conv1_b'], H, W)  # conv1 + in2
    out3 = self_attention_in(y_nc, kv_chunk=kv_chunk, **params['sa2'])         # sa2 + in3
    out = cross_attention_in(out2, out3, y_nc, kv_chunk=kv_chunk, **params['top'])  # attn + in4 + in5
    out = conv3x3_residual_in(out, params['conv2_w'], params['conv2_b'], H, W)  # conv2 + in6

    return jnp.transpose(out.reshape(B, H, W, C), (0, 3, 1, 2))                # back to NCHW


# ---------------------------------------------------------------------------
# Pure-JAX reference (for correctness check)
# ---------------------------------------------------------------------------
def _ref_attn(x_qk, x_v, x_res, *, wq, bq, wk, bk, wv, bv, gamma):
    hi = jax.lax.Precision.HIGHEST
    q = jnp.einsum('bnc,cd->bnd', x_qk, wq, precision=hi) + bq
    k = jnp.einsum('bnc,cd->bnd', x_qk, wk, precision=hi) + bk
    v = jnp.einsum('bnc,cd->bnd', x_v, wv, precision=hi) + bv
    energy = jnp.einsum('bnd,bmd->bnm', q, k, precision=hi)
    attn = jax.nn.softmax(energy, axis=-1)
    out = jnp.einsum('bnm,bmc->bnc', attn, v, precision=hi)
    return gamma * out + x_res


def _ref_in(x):
    mean = jnp.mean(x, axis=1, keepdims=True)
    var = jnp.mean((x - mean) ** 2, axis=1, keepdims=True)
    return (x - mean) * jax.lax.rsqrt(var + EPS)


def _ref_conv(x_nc, w, b, H, W):
    B, N, C = x_nc.shape
    out = jax.lax.conv_general_dilated(
        x_nc.reshape(B, H, W, C), w, (1, 1), 'SAME',
        dimension_numbers=('NHWC', 'HWIO', 'NHWC'),
        precision=jax.lax.Precision.HIGHEST)
    return (out + b).reshape(B, N, -1)


def ref_forward(x, y, params, H, W):
    B, C = x.shape[0], x.shape[1]
    x_nc = jnp.transpose(x, (0, 2, 3, 1)).reshape(B, H * W, C)
    y_nc = jnp.transpose(y, (0, 2, 3, 1)).reshape(B, H * W, C)
    out1 = _ref_in(_ref_attn(x_nc, x_nc, x_nc, **params['sa1']))
    out2 = _ref_in(out1 + _ref_conv(out1, params['conv1_w'], params['conv1_b'], H, W))
    out3 = _ref_in(_ref_attn(y_nc, y_nc, y_nc, **params['sa2']))
    out = _ref_attn(out2, out3, y_nc, **params['top'])
    out = _ref_in(_ref_in(out) + out3)
    out = _ref_in(out + _ref_conv(out, params['conv2_w'], params['conv2_b'], H, W))
    return jnp.transpose(out.reshape(B, H, W, C), (0, 3, 1, 2))


# ---------------------------------------------------------------------------
# Deterministic parameter init (shapes from the module's __init__)
# ---------------------------------------------------------------------------
def init_params(key, C):
    Cq = C // 8
    ks = iter(jax.random.split(key, 32))

    def w(shape, scale=0.2):
        return scale * jax.random.normal(next(ks), shape, jnp.float32)

    def attn_params():
        # 1x1 conv weights stored as (Cin, Cout); gamma nonzero to exercise the path
        # (torch init is zeros(1), which would make attention a no-op).
        return dict(wq=w((C, Cq)), bq=w((1, Cq)),
                    wk=w((C, Cq)), bk=w((1, Cq)),
                    wv=w((C, C)), bv=w((1, C)),
                    gamma=jnp.float32(0.5))

    return dict(
        sa1=attn_params(),
        sa2=attn_params(),
        top=attn_params(),
        conv1_w=w((3, 3, C, C), 0.1), conv1_b=w((C,), 0.1),   # HWIO layout
        conv2_w=w((3, 3, C, C), 0.1), conv2_b=w((C,), 0.1),
    )


if __name__ == "__main__":
    B, C, H, W = 2, 16, 8, 8        # in_dim must be divisible by 8 (in_dim // 8 heads dim)
    key = jax.random.PRNGKey(0)
    k_x, k_y, k_p = jax.random.split(key, 3)
    x = jax.random.normal(k_x, (B, C, H, W), jnp.float32)
    y = jax.random.normal(k_y, (B, C, H, W), jnp.float32)
    params = init_params(k_p, C)

    # kv_chunk=32 with N=64 -> two KV chunks, exercising the online-softmax path.
    out = trans_attn_forward(x, y, params, H, W, kv_chunk=32)
    out = jax.block_until_ready(out)

    ref = ref_forward(x, y, params, H, W)
    assert out.shape == (B, C, H, W)
    # bf16 MXU operands (f32 accumulation / f32 softmax & norm stats) vs f32 reference.
    err = float(jnp.max(jnp.abs(out - ref)))
    assert jnp.allclose(out, ref, atol=3e-2, rtol=3e-2), err
    print("KERNEL_OK")
</pallas_src>

<mosaic_0001>
module attributes {stable_mosaic.version = 11 : i64} {
  func.func @_self_attn_in_kernel(%arg0: i32, %arg1: memref<1x64x16xf32, #tpu.memory_space<vmem>>, %arg2: memref<16x4xbf16, #tpu.memory_space<vmem>>, %arg3: memref<1x4xf32, #tpu.memory_space<vmem>>, %arg4: memref<16x16xbf16, #tpu.memory_space<vmem>>, %arg5: memref<1x16xf32, #tpu.memory_space<vmem>>, %arg6: memref<1x1xf32, #tpu.memory_space<smem>>, %arg7: memref<1x64x16xf32, #tpu.memory_space<vmem>>) attributes {dimension_semantics = [#tpu.dimension_semantics<parallel>], iteration_bounds = array<i64: 2>, scalar_prefetch = 0 : i64, scratch_operands = 0 : i64, tpu.core_type = #tpu.core_type<tc>, window_params = [{transform_indices = @transform_0, window_bounds = array<i64: 1, 64, 16>}, {pipeline_mode = #tpu.pipeline_mode<synchronous>, transform_indices = @transform_1, window_bounds = array<i64: 16, 4>}, {pipeline_mode = #tpu.pipeline_mode<synchronous>, transform_indices = @transform_2, window_bounds = array<i64: 1, 4>}, {pipeline_mode = #tpu.pipeline_mode<synchronous>, transform_indices = @transform_3, window_bounds = array<i64: 16, 16>}, {pipeline_mode = #tpu.pipeline_mode<synchronous>, transform_indices = @transform_4, window_bounds = array<i64: 1, 16>}, {transform_indices = @transform_5, window_bounds = array<i64: 1, 1>}, {transform_indices = @transform_6, window_bounds = array<i64: 1, 64, 16>}]} {
    %c0 = arith.constant 0 : index
    %c0_0 = arith.constant 0 : index
    %c0_1 = arith.constant 0 : index
    %0 = vector.load %arg1[%c0, %c0_0, %c0_1] : memref<1x64x16xf32, #tpu.memory_space<vmem>>, vector<1x64x16xf32>
    %1 = vector.shape_cast %0 : vector<1x64x16xf32> to vector<64x16xf32>
    %2 = arith.truncf %1 : vector<64x16xf32> to vector<64x16xbf16>
    %c0_2 = arith.constant 0 : index
    %c0_3 = arith.constant 0 : index
    %3 = vector.load %arg2[%c0_2, %c0_3] : memref<16x4xbf16, #tpu.memory_space<vmem>>, vector<16x4xbf16>
    %cst = arith.constant dense<0.000000e+00> : vector<64x4xf32>
    %4 = tpu.matmul %2, %3, %cst {dimension_numbers = #tpu.dot_dimension_numbers<[1], [0], [0], [1], [0, 0, 1, 1], [], []>} : vector<64x16xbf16>, vector<16x4xbf16>, vector<64x4xf32> -> vector<64x4xf32>
    %c0_4 = arith.constant 0 : index
    %c0_5 = arith.constant 0 : index
    %5 = vector.load %arg3[%c0_4, %c0_5] : memref<1x4xf32, #tpu.memory_space<vmem>>, vector<1x4xf32>
    %6 = vector.broadcast %5 : vector<1x4xf32> to vector<64x4xf32>
    %7 = arith.addf %4, %6 : vector<64x4xf32>
    %8 = arith.truncf %1 : vector<64x16xf32> to vector<64x16xbf16>
    %c0_6 = arith.constant 0 : index
    %c0_7 = arith.constant 0 : index
    %9 = vector.load %arg4[%c0_6, %c0_7] : memref<16x16xbf16, #tpu.memory_space<vmem>>, vector<16x16xbf16>
    %cst_8 = arith.constant dense<0.000000e+00> : vector<64x16xf32>
    %10 = tpu.matmul %8, %9, %cst_8 {dimension_numbers = #tpu.dot_dimension_numbers<[1], [0], [0], [1], [0, 0, 1, 1], [], []>} : vector<64x16xbf16>, vector<16x16xbf16>, vector<64x16xf32> -> vector<64x16xf32>
    %c0_9 = arith.constant 0 : index
    %c0_10 = arith.constant 0 : index
    %11 = vector.load %arg5[%c0_9, %c0_10] : memref<1x16xf32, #tpu.memory_space<vmem>>, vector<1x16xf32>
    %12 = vector.broadcast %11 : vector<1x16xf32> to vector<64x16xf32>
    %13 = arith.addf %10, %12 : vector<64x16xf32>
    %14 = vector.extract_strided_slice %7 {offsets = [0, 0], sizes = [64, 2], strides = [1, 1]} : vector<64x4xf32> to vector<64x2xf32>
    %15 = arith.truncf %14 : vector<64x2xf32> to vector<64x2xbf16>
    %16 = vector.extract_strided_slice %7 {offsets = [0, 2], sizes = [64, 2], strides = [1, 1]} : vector<64x4xf32> to vector<64x2xf32>
    %17 = arith.truncf %16 : vector<64x2xf32> to vector<64x2xbf16>
    %18 = arith.truncf %13 : vector<64x16xf32> to vector<64x16xbf16>
    %cst_11 = arith.constant 0xFF800000 : f32
    %19 = vector.broadcast %cst_11 : f32 to vector<64x1xf32>
    %cst_12 = arith.constant 0.000000e+00 : f32
    %20 = vector.broadcast %cst_12 : f32 to vector<64x1xf32>
    %cst_13 = arith.constant 0.000000e+00 : f32
    %21 = vector.broadcast %cst_13 : f32 to vector<64x16xf32>
    %22 = vector.extract_strided_slice %17 {offsets = [0, 0], sizes = [32, 2], strides = [1, 1]} : vector<64x2xbf16> to vector<32x2xbf16>
    %23 = vector.extract_strided_slice %18 {offsets = [0, 0], sizes = [32, 16], strides = [1, 1]} : vector<64x16xbf16> to vector<32x16xbf16>
    %cst_14 = arith.constant dense<0.000000e+00> : vector<64x32xf32>
    %24 = tpu.matmul %15, %22, %cst_14 {dimension_numbers = #tpu.dot_dimension_numbers<[1], [1], [0], [0], [0, 0, 1, 0], [], []>} : vector<64x2xbf16>, vector<32x2xbf16>, vector<64x32xf32> -> vector<64x32xf32>
    %cst_15 = arith.constant dense<0xFF800000> : vector<64xf32>
    %25 = vector.multi_reduction <maximumf>, %24, %cst_15 [1] : vector<64x32xf32> to vector<64xf32>
    %26 = vector.shape_cast %25 : vector<64xf32> to vector<64x1xf32>
    %27 = arith.maximumf %19, %26 : vector<64x1xf32>
    %28 = arith.subf %19, %27 : vector<64x1xf32>
    %29 = math.exp %28 : vector<64x1xf32>
    %30 = vector.broadcast %27 : vector<64x1xf32> to vector<64x32xf32>
    %31 = arith.subf %24, %30 : vector<64x32xf32>
    %32 = math.exp %31 : vector<64x32xf32>
    %33 = arith.mulf %29, %20 : vector<64x1xf32>
    %cst_16 = arith.constant dense<0.000000e+00> : vector<64xf32>
    %34 = vector.multi_reduction <add>, %32, %cst_16 [1] : vector<64x32xf32> to vector<64xf32>
    %35 = vector.shape_cast %34 : vector<64xf32> to vector<64x1xf32>
    %36 = arith.addf %33, %35 : vector<64x1xf32>
    %37 = vector.broadcast %29 : vector<64x1xf32> to vector<64x16xf32>
    %38 = arith.mulf %37, %21 : vector<64x16xf32>
    %39 = arith.truncf %32 : vector<64x32xf32> to vector<64x32xbf16>
    %cst_17 = arith.constant dense<0.000000e+00> : vector<64x16xf32>
    %40 = tpu.matmul %39, %23, %cst_17 {dimension_numbers = #tpu.dot_dimension_numbers<[1], [0], [0], [1], [0, 0, 1, 1], [], []>} : vector<64x32xbf16>, vector<32x16xbf16>, vector<64x16xf32> -> vector<64x16xf32>
    %41 = arith.addf %38, %40 : vector<64x16xf32>
    %42 = vector.extract_strided_slice %17 {offsets = [32, 0], sizes = [32, 2], strides = [1, 1]} : vector<64x2xbf16> to vector<32x2xbf16>
    %43 = vector.extract_strided_slice %18 {offsets = [32, 0], sizes = [32, 16], strides = [1, 1]} : vector<64x16xbf16> to vector<32x16xbf16>
    %cst_18 = arith.constant dense<0.000000e+00> : vector<64x32xf32>
    %44 = tpu.matmul %15, %42, %cst_18 {dimension_numbers = #tpu.dot_dimension_numbers<[1], [1], [0], [0], [0, 0, 1, 0], [], []>} : vector<64x2xbf16>, vector<32x2xbf16>, vector<64x32xf32> -> vector<64x32xf32>
    %cst_19 = arith.constant dense<0xFF800000> : vector<64xf32>
    %45 = vector.multi_reduction <maximumf>, %44, %cst_19 [1] : vector<64x32xf32> to vector<64xf32>
    %46 = vector.shape_cast %45 : vector<64xf32> to vector<64x1xf32>
    %47 = arith.maximumf %27, %46 : vector<64x1xf32>
    %48 = arith.subf %27, %47 : vector<64x1xf32>
    %49 = math.exp %48 : vector<64x1xf32>
    %50 = vector.broadcast %47 : vector<64x1xf32> to vector<64x32xf32>
    %51 = arith.subf %44, %50 : vector<64x32xf32>
    %52 = math.exp %51 : vector<64x32xf32>
    %53 = arith.mulf %49, %36 : vector<64x1xf32>
    %cst_20 = arith.constant dense<0.000000e+00> : vector<64xf32>
    %54 = vector.multi_reduction <add>, %52, %cst_20 [1] : vector<64x32xf32> to vector<64xf32>
    %55 = vector.shape_cast %54 : vector<64xf32> to vector<64x1xf32>
    %56 = arith.addf %53, %55 : vector<64x1xf32>
    %57 = vector.broadcast %49 : vector<64x1xf32> to vector<64x16xf32>
    %58 = arith.mulf %57, %41 : vector<64x16xf32>
    %59 = arith.truncf %52 : vector<64x32xf32> to vector<64x32xbf16>
    %cst_21 = arith.constant dense<0.000000e+00> : vector<64x16xf32>
    %60 = tpu.matmul %59, %43, %cst_21 {dimension_numbers = #tpu.dot_dimension_numbers<[1], [0], [0], [1], [0, 0, 1, 1], [], []>} : vector<64x32xbf16>, vector<32x16xbf16>, vector<64x16xf32> -> vector<64x16xf32>
    %61 = arith.addf %58, %60 : vector<64x16xf32>
    %62 = tpu.reciprocal %56 {approx = true} : vector<64x1xf32> -> vector<64x1xf32>
    %63 = vector.broadcast %62 : vector<64x1xf32> to vector<64x16xf32>
    %64 = arith.mulf %61, %63 : vector<64x16xf32>
    %c0_22 = arith.constant 0 : index
    %c0_23 = arith.constant 0 : index
    %65 = memref.load %arg6[%c0_22, %c0_23] : memref<1x1xf32, #tpu.memory_space<smem>>
    %66 = vector.broadcast %65 : f32 to vector<64x16xf32>
    %67 = arith.mulf %66, %64 : vector<64x16xf32>
    %68 = arith.addf %67, %1 : vector<64x16xf32>
    %cst_24 = arith.constant dense<0.000000e+00> : vector<16xf32>
    %69 = vector.multi_reduction <add>, %68, %cst_24 [0] : vector<64x16xf32> to vector<16xf32>
    %70 = vector.shape_cast %69 : vector<16xf32> to vector<1x16xf32>
    %cst_25 = arith.constant 6.400000e+01 : f32
    %71 = vector.broadcast %cst_25 : f32 to vector<1x16xf32>
    %72 = arith.divf %70, %71 : vector<1x16xf32>
    %73 = vector.broadcast %72 : vector<1x16xf32> to vector<64x16xf32>
    %74 = arith.subf %68, %73 : vector<64x16xf32>
    %75 = arith.mulf %74, %74 : vector<64x16xf32>
    %cst_26 = arith.constant dense<0.000000e+00> : vector<16xf32>
    %76 = vector.multi_reduction <add>, %75, %cst_26 [0] : vector<64x16xf32> to vector<16xf32>
    %77 = vector.shape_cast %76 : vector<16xf32> to vector<1x16xf32>
    %cst_27 = arith.constant 6.400000e+01 : f32
    %78 = vector.broadcast %cst_27 : f32 to vector<1x16xf32>
    %79 = arith.divf %77, %78 : vector<1x16xf32>
    %cst_28 = arith.constant 9.99999974E-6 : f32
    %80 = vector.broadcast %cst_28 : f32 to vector<1x16xf32>
    %81 = arith.addf %79, %80 : vector<1x16xf32>
    %82 = math.rsqrt %81 : vector<1x16xf32>
    %83 = vector.broadcast %82 : vector<1x16xf32> to vector<64x16xf32>
    %84 = arith.mulf %74, %83 : vector<64x16xf32>
    %c0_29 = arith.constant 0 : index
    %c0_30 = arith.constant 0 : index
    %c0_31 = arith.constant 0 : index
    %85 = vector.load %arg7[%c0_29, %c0_30, %c0_31] : memref<1x64x16xf32, #tpu.memory_space<vmem>>, vector<1x64x16xf32>
    %86 = vector.shape_cast %85 : vector<1x64x16xf32> to vector<64x16xf32>
    %87 = vector.shape_cast %84 : vector<64x16xf32> to vector<1x64x16xf32>
    tpu.vector_store %arg7[%c0_29, %c0_30, %c0_31], %87 {strides = array<i32>} : memref<1x64x16xf32, #tpu.memory_space<vmem>>, vector<1x64x16xf32>,
    return
  }
  func.func @transform_0(%arg0: i32) -> (i32, i32, i32) {
    %c0_i32 = arith.constant 0 : i32
    %c0_i32_0 = arith.constant 0 : i32
    %c0_i32_1 = arith.constant 0 : i32
    return %arg0, %c0_i32, %c0_i32_0 : i32, i32, i32
  }
  func.func @transform_1(%arg0: i32) -> (i32, i32) {
    %c0_i32 = arith.constant 0 : i32
    %c0_i32_0 = arith.constant 0 : i32
    %c0_i32_1 = arith.constant 0 : i32
    return %c0_i32, %c0_i32_0 : i32, i32
  }
  func.func @transform_2(%arg0: i32) -> (i32, i32) {
    %c0_i32 = arith.constant 0 : i32
    %c0_i32_0 = arith.constant 0 : i32
    %c0_i32_1 = arith.constant 0 : i32
    return %c0_i32, %c0_i32_0 : i32, i32
  }
  func.func @transform_3(%arg0: i32) -> (i32, i32) {
    %c0_i32 = arith.constant 0 : i32
    %c0_i32_0 = arith.constant 0 : i32
    %c0_i32_1 = arith.constant 0 : i32
    return %c0_i32, %c0_i32_0 : i32, i32
  }
  func.func @transform_4(%arg0: i32) -> (i32, i32) {
    %c0_i32 = arith.constant 0 : i32
    %c0_i32_0 = arith.constant 0 : i32
    %c0_i32_1 = arith.constant 0 : i32
    return %c0_i32, %c0_i32_0 : i32, i32
  }
  func.func @transform_5(%arg0: i32) -> (i32, i32) {
    %c0_i32 = arith.constant 0 : i32
    %c0_i32_0 = arith.constant 0 : i32
    %c0_i32_1 = arith.constant 0 : i32
    return %c0_i32, %c0_i32_0 : i32, i32
  }
  func.func @transform_6(%arg0: i32) -> (i32, i32, i32) {
    %c0_i32 = arith.constant 0 : i32
    %c0_i32_0 = arith.constant 0 : i32
    %c0_i32_1 = arith.constant 0 : i32
    return %arg0, %c0_i32, %c0_i32_0 : i32, i32, i32
  }
}

</mosaic_0001>

<bundles_post_ra>
// kernel: tpu_custom_call.1
= control target key start
LH: loop header
LB: loop body
LE: loop exit
PB: predicated region body
PF: predicated region fallthrough
CT: control target
= control target key end

     0   :  { %s1488_s23 = smov 0   ;;  %s1837_s0 = inlined_call_operand.vmem [shape: f32[2,64,16], index: 0, kind: input, shape index: {}]   ;;  %s1838_s1 = inlined_call_operand.vmem [shape: bf16[16,4], index: 1, kind: input, shape index: {}]   ;;  %s1839_s2 = inlined_call_operand.vmem [shape: f32[1,4], index: 2, kind: input, shape index: {}]   ;;  %s1840_s3 = inlined_call_operand.vmem [shape: bf16[16,16], index: 3, kind: input, shape index: {}]   ;;  %s1841_s4 = inlined_call_operand.vmem [shape: f32[1,16], index: 4, kind: input, shape index: {}]   ;;  %s1842_s5 = inlined_call_operand.<no memory space> [shape: f32[1,1], index: 5, kind: input, shape index: {}]   ;;  %s1843_s6 = inlined_call_operand.vmem [shape: f32[2,64,16], index: 6, kind: output, shape index: {}]  }
   0x1   :  { %11 = sst [smem:[#allocation2]] %s1842_s5 }
   0x2 LB: > { %s1201_s24 = sadd.s32 4294967295, %s1447_s23   ;;  %p1205_p0 = scmp.ge.s32.totalorder %s1447_s23, 1  ;;  %s1447_s23 = sphi %s1488_s23, %s17_s23  }
   0x3   : > { %p213_p1 = scmp.lt.s32.totalorder %s1447_s23, 3 }
   0x5   : > { %p214_p2 = pnand %p1205_p0, %p213_p1 }
   0x6   : > { %p243_p3 = scmp.lt.s32.totalorder (!%p214_p2), %s1201_s24, 1  ;;  %s1449_s8 = smov (!%p214_p2), 126  }
   0x7   : > { %217 = sbr.rel (%p214_p2) target bundleno = 1023 (0x3ff), region = 44  ;;  %s1049_s13 = sld [smem:[#allocation2]] (!%p214_p2) }
   0xc   : > { %v1357_v0 = vld [vmem:[%s1838_s1] sm:$0xff]   ;;  %s1845_s24 = smov (!%p243_p3, %s1201_s24), 1  ;;  %vm281_vm0 = vcmask 130048   ;;  %vm453_vm1 = vcmask 15360   ;;  %vm537_vm2 = vcmask 261120  }
   0xd   : > { %1276 = vmatprep.subr.bf16.mxu0 %v1357_v0  ;;  %s1240_s5 = sshll.u32 %s1845_s24, 6  ;;  %v1210_v14 = vld [vmem:[%s1839_s2] ss:$0 sm:$0xff] }
   0xe   : > { %1277 = vmatpush3.bf16.msra.mxu0 %v1357_v0  ;;  %s247_s29 = scalar_lea.vmem %s1837_s0, %s1240_s5  ;;  %v1358_v34 = vld [vmem:[%s1840_s3] sm:$0xff]   ;;  %s252_s16 = scalar_lea.vmem %s1843_s6, %s1240_s5 }
   0xf   : > { %v1507_v1 = vld [vmem:[%s247_s29] sm:$0xff]  ;;  %v1509_v2 = vld [vmem:[%s247_s29 + $0x8] sm:$0xff]  ;;  %v1511_v3 = vld [vmem:[%s247_s29 + $0x10] sm:$0xff]  ;;  %1286 = vmatprep.subr.bf16.mxu1 %v1358_v34 }
  0x10   : > { %v262_v4 = vpack.c.bf16 %v1509_v2, %v1507_v1  ;;  %v1515_v5 = vld [vmem:[%s247_s29 + $0x18] sm:$0xff]  ;;  %v1517_v6 = vld [vmem:[%s247_s29 + $0x20] sm:$0xff]  ;;  %v1519_v7 = vld [vmem:[%s247_s29 + $0x28] sm:$0xff]  ;;  %1287 = vmatpush3.bf16.msra.mxu1 %v1358_v34 }
  0x11   : > { %v263_v8 = vpack.c.bf16 %v1515_v5, %v1511_v3  ;;  %v264_v9 = vpack.c.bf16 %v1519_v7, %v1517_v6  ;;  %v1529_v10 = vld [vmem:[%s247_s29 + $0x30] sm:$0xff]  ;;  %v1531_v11 = vld [vmem:[%s247_s29 + $0x38] sm:$0xff]  ;;  %v1592_v58 = vld [vmem:[%s1841_s4] ss:$0 sm:$0xff] }
  0x12   : > { %1278 = vmatprep.mubr.msk.bf16.mxu0 %vm281_vm0, %v262_v4  ;;  %1288 = vmatprep.mubr.msk.bf16.mxu1 %vm281_vm0, %v262_v4  ;;  %v265_v12 = vpack.c.bf16 %v1531_v11, %v1529_v10 }
  0x13   : > { %1279 = vmatmul.mubr.msk.bf16.vlgmr.msra.gmra.mxu0 %vm281_vm0, %v263_v8  ;;  %1289 = vmatmul.mubr.msk.bf16.vlgmr.msra.gmra.mxu1 %vm281_vm0, %v263_v8 }
  0x14   : > { %1282 = vmatprep.mubr.msk.bf16.mxu0 %vm281_vm0, %v264_v9  ;;  %1292 = vmatprep.mubr.msk.bf16.mxu1 %vm281_vm0, %v264_v9 }
  0x1b   : > { %1283 = vmatmul.mubr.msk.bf16.gmra.mxu0 %vm281_vm0, %v265_v12  ;;  %1293 = vmatmul.mubr.msk.bf16.gmra.mxu1 %vm281_vm0, %v265_v12 }
  0xd3   : > { %v1280_v13 = vpop.f32.mrf.mxu0  ;;  %v1290_v55 = vpop.f32.mrf.mxu1 }
  0xd4   : > { %v337_v17 = vadd.f32 %v1280_v13, %v1210_v14  ;;  %v417_v63 = vadd.f32 %v1290_v55, %v1592_v58 }
  0xd5   : > { %v328_v15 = vpop.f32.mrf.mxu0  ;;  %v408_v61 = vpop.f32.mrf.mxu1 }
  0xd6   : > { %v329_v20 = vadd.f32 %v1210_v14, %v328_v15  ;;  %v409_v13 = vadd.f32 %v1592_v58, %v408_v61 }
  0xd7   : > { %v1281_v16 = vpop.f32.mrf.mxu0  ;;  %v1291_v4 = vpop.f32.mrf.mxu1 }
  0xd8   : > { %v340_v18 = vadd.f32 %v1281_v16, %v1210_v14  ;;  %v420_v9 = vadd.f32 %v1291_v4, %v1592_v58 }
  0xd9   : > { %v331_v19 = vpop.f32.mrf.mxu0  ;;  %v411_v16 = vpop.f32.mrf.mxu1 }
  0xda   : > { %v440_v21 = vpack.c.bf16 %v340_v18, %v337_v17  ;;  %v332_v22 = vadd.f32 %v1210_v14, %v331_v19  ;;  %v412_v19 = vadd.f32 %v1592_v58, %v411_v16 }
  0xdb   : > { %v1284_v23 = vpop.f32.mrf.mxu0 }
  0xdc   : > { %v439_v24 = vpack.c.bf16 %v332_v22, %v329_v20  ;;  %451 = vrot.lane.b32.xlu0 %v440_v21, %s1449_s8  ;;  %v353_v26 = vadd.f32 %v1284_v23, %v1210_v14 }
  0xdd   : > { %v344_v25 = vpop.f32.mrf.mxu0 }
  0xde   : > { %1300 = vmatprep.mubr.msk.bf16.mxu0 %vm453_vm1, %v439_v24  ;;  %v345_v28 = vadd.f32 %v1210_v14, %v344_v25 }
  0xdf   : > { %v1285_v27 = vpop.f32.mrf.mxu0 }
  0xe0   : > { %v356_v29 = vadd.f32 %v1285_v27, %v1210_v14  ;;  %449 = vrot.lane.b32.xlu0 %v439_v24, %s1449_s8 }
  0xe1   : > { %v347_v30 = vpop.f32.mrf.mxu0 }
  0xe2   : > { %v442_v31 = vpack.c.bf16 %v356_v29, %v353_v26  ;;  %v348_v32 = vadd.f32 %v1210_v14, %v347_v30  ;;  %v444_v14 = vpack.c.bf16 %v420_v9, %v417_v63  ;;  %v1294_v29 = vpop.f32.mrf.mxu1 }
  0xe4   : > { %v441_v33 = vpack.c.bf16 %v348_v32, %v345_v28  ;;  %743 = vrot.lane.b32.xlu1 %v442_v31, %s1449_s8  ;;  %1308 = vmatprep.subr.bf16.mxu1 %v444_v14  ;;  %v433_v32 = vadd.f32 %v1294_v29, %v1592_v58 }
  0xe5   : > { %1309 = vmatpush3.bf16.msra.mxu1 %v444_v14 }
  0xe8   : > { %741 = vrot.lane.b32.xlu1 %v441_v33, %s1449_s8 }
 0x14e   : > { %v452_v35 = vpop.permute.xlu0 %451 }
 0x14f   : > { %v470_v36 = vsel %vm453_vm1, %v452_v35, 0  ;;  %1344 = vmatprep.subr.msk.bf16.mxu0 %vm453_vm1, %v452_v35 }
 0x150   : > { %1297 = vmatpush3.bf16.xpose.msra.mxu0 %v470_v36 }
 0x152   : > { %v450_v37 = vpop.permute.xlu0 %449 }
 0x153   : > { %1345 = vmatprep.subr.msk.bf16.mxu0 %vm453_vm1, %v450_v37  ;;  %v467_v38 = vsel %vm453_vm1, %v450_v37, 0 }
 0x156   : > { %v744_v39 = vpop.permute.xlu1 %743 }
 0x157   : > { %v749_v40 = vsel %vm453_vm1, %v744_v39, 0 }
 0x158   : > { %1299 = vmatpush3.bf16.xpose.msra.mxu0 %v467_v38 }
 0x159   : > { %1346 = vmatprep.subr.msk.bf16.mxu0 %vm453_vm1, %v744_v39 }
 0x15a   : > { %v742_v41 = vpop.permute.xlu1 %741 }
 0x15b   : > { %v746_v42 = vsel %vm453_vm1, %v742_v41, 0 }
 0x15f   : > { %1301 = vmatmul.mubr.msk.bf16.vlgmr.msra.gmra.mxu0 %vm453_vm1, %v440_v21 }
 0x160   : > { %1304 = vmatprep.mubr.msk.bf16.mxu0 %vm453_vm1, %v441_v33  ;;  %1321 = vmatpush3.bf16.xpose.msra.mxu0 %v749_v40 }
 0x161   : > { %1347 = vmatprep.subr.msk.bf16.mxu0 %vm453_vm1, %v742_v41 }
 0x167   : > { %1305 = vmatmul.mubr.msk.bf16.gmra.mxu0 %vm453_vm1, %v442_v31 }
 0x168   : > { %1323 = vmatpush3.bf16.xpose.msra.mxu0 %v746_v42  ;;  %1324 = vmatprep.mubr.msk.bf16.mxu0 %vm453_vm1, %v439_v24 }
 0x16f   : > { %1325 = vmatmul.mubr.msk.bf16.vlgmr.msra.gmra.mxu0 %vm453_vm1, %v440_v21  ;;  %v443_v21 = vpack.c.bf16 %v412_v19, %v409_v13 }
 0x170   : > { %1328 = vmatprep.mubr.msk.bf16.mxu0 %vm453_vm1, %v441_v33 }
 0x171   : > { %1310 = vmatprep.subr.bf16.mxu1 %v443_v21 }
 0x172   : > { %1311 = vmatpush3.bf16.msra.mxu1 %v443_v21 }
 0x177   : > { %1329 = vmatmul.mubr.msk.bf16.gmra.mxu0 %vm453_vm1, %v442_v31  ;;  %v424_v31 = vpop.f32.mrf.mxu1 }
 0x179   : > { %v1295_v33 = vpop.f32.mrf.mxu1 }
 0x17a   : > { %v436_v34 = vadd.f32 %v1295_v33, %v1592_v58 }
 0x17b   : > { %v427_v14 = vpop.f32.mrf.mxu1 }
 0x17c   : > { %v1636_v35 = vpack.c.bf16 %v436_v34, %v433_v32  ;;  %v428_v21 = vadd.f32 %v1592_v58, %v427_v14 }
 0x17e   : > { %1332 = vmatprep.subr.bf16.mxu1 %v1636_v35 }
 0x21f   : > { %v1561_v43 = vpop.f32.mrf.mxu0 }
 0x220   : > { %v544_v44 = vsel %vm537_vm2, %v1561_v43, -inf }
 0x221   : > { %545 = vmax.xlane.f32.xlu0 %v544_v44  ;;  %v1565_v45 = vpop.f32.mrf.mxu0 }
 0x222   : > { %v538_v47 = vsel %vm537_vm2, %v1565_v45, -inf }
 0x223   : > { %v1567_v46 = vpop.f32.mrf.mxu0 }
 0x224   : > { %v547_v51 = vsel %vm537_vm2, %v1567_v46, -inf }
 0x225   : > { %539 = vmax.xlane.f32.xlu0 %v538_v47  ;;  %v1571_v48 = vpop.f32.mrf.mxu0 }
 0x226   : > { %v541_v49 = vsel %vm537_vm2, %v1571_v48, -inf }
 0x227   : > { %542 = vmax.xlane.f32.xlu1 %v541_v49  ;;  %v1575_v50 = vpop.f32.mrf.mxu0 }
 0x228   : > { %v556_v53 = vsel %vm537_vm2, %v1575_v50, -inf }
 0x229   : > { %548 = vmax.xlane.f32.xlu0 %v547_v51  ;;  %v1579_v52 = vpop.f32.mrf.mxu0 }
 0x22a   : > { %v550_v59 = vsel %vm537_vm2, %v1579_v52, -inf }
 0x22b   : > { %557 = vmax.xlane.f32.xlu1 %v556_v53  ;;  %v1583_v54 = vpop.f32.mrf.mxu0 }
 0x22c   : > { %v559_v56 = vsel %vm537_vm2, %v1583_v54, -inf }
 0x22d   : > { %560 = vmax.xlane.f32.xlu0 %v559_v56  ;;  %v1587_v57 = vpop.f32.mrf.mxu0 }
 0x22e   : > { %v553_v62 = vsel %vm537_vm2, %v1587_v57, -inf }
 0x22f   : > { %551 = vmax.xlane.f32.xlu1 %v550_v59  ;;  %v1596_v60 = vpop.f32.mrf.mxu0 }
 0x230   : > { %v822_v17 = vsel %vm537_vm2, %v1596_v60, -inf }
 0x231   : > { %v1601_v0 = vpop.f32.mrf.mxu0  ;;  %554 = vmax.xlane.f32.xlu0 %v553_v62 }
 0x232   : > { %v816_v8 = vsel %vm537_vm2, %v1601_v0, -inf }
 0x233   : > { %817 = vmax.xlane.f32.xlu1 %v816_v8  ;;  %v1606_v12 = vpop.f32.mrf.mxu0 }
 0x234   : > { %v825_v24 = vsel %vm537_vm2, %v1606_v12, -inf }
 0x235   : > { %v1609_v15 = vpop.f32.mrf.mxu0 }
 0x236   : > { %v819_v18 = vsel %vm537_vm2, %v1609_v15, -inf }
 0x237   : > { %823 = vmax.xlane.f32.xlu1 %v822_v17  ;;  %v1616_v20 = vpop.f32.mrf.mxu0  ;;  %820 = vmax.xlane.f32.xlu0 %v819_v18  ;;  %v425_v17 = vadd.f32 %v1592_v58, %v424_v31 }
 0x238   : > { %v834_v27 = vsel %vm537_vm2, %v1616_v20, -inf }
 0x239   : > { %v1618_v22 = vpop.f32.mrf.mxu0 }
 0x23a   : > { %v828_v23 = vsel %vm537_vm2, %v1618_v22, -inf }
 0x23b   : > { %829 = vmax.xlane.f32.xlu1 %v828_v23  ;;  %v1624_v25 = vpop.f32.mrf.mxu0  ;;  %826 = vmax.xlane.f32.xlu0 %v825_v24 }
 0x23c   : > { %v837_v30 = vsel %vm537_vm2, %v1624_v25, -inf }
 0x23d   : > { %v1626_v26 = vpop.f32.mrf.mxu0 }
 0x23e   : > { %v831_v28 = vsel %vm537_vm2, %v1626_v26, -inf }
 0x23f   : > { %835 = vmax.xlane.f32.xlu1 %v834_v27  ;;  %832 = vmax.xlane.f32.xlu0 %v831_v28 }
 0x243   : > { %838 = vmax.xlane.f32.xlu0 %v837_v30 }
 0x2aa   : > { %v1639_v36 = vpop.xlane.xlu0 %545 }
 0x2ab   : > { %v588_v37 = vsub.f32 %v1561_v43, %v1639_v36 }
 0x2ad   : > { %v598_v38 = vmul.f32 1.442695, %v588_v37 }
 0x2ae   : > { %v1643_v39 = vpop.xlane.xlu0 %539 }
 0x2af   : > { %1359 = vpow2.f32 %v598_v38  ;;  %v586_v40 = vsub.f32 %v1565_v45, %v1643_v39 }
 0x2b0   : > { %v1647_v41 = vpop.xlane.xlu1 %542 }
 0x2b1   : > { %v594_v42 = vmul.f32 1.442695, %v586_v40  ;;  %v587_v44 = vsub.f32 %v1571_v48, %v1647_v41  ;;  %v445_v40 = vpack.c.bf16 %v428_v21, %v425_v17 }
 0x2b2   : > { %v1651_v47 = vpop.xlane.xlu0 %548 }
 0x2b3   : > { %1361 = vpow2.f32 %v594_v42  ;;  %v596_v49 = vmul.f32 1.442695, %v587_v44  ;;  %v589_v43 = vsub.f32 %v1567_v46, %v1651_v47 }
 0x2b4   : > { %v1655_v51 = vpop.xlane.xlu1 %557 }
 0x2b5   : > { %1363 = vpow2.f32 %v596_v49  ;;  %v600_v53 = vmul.f32 1.442695, %v589_v43  ;;  %v592_v48 = vsub.f32 %v1575_v50, %v1655_v51 }
 0x2b6   : > { %v1657_v55 = vpop.xlane.xlu0 %560 }
 0x2b7   : > { %v593_v45 = vsub.f32 %v1583_v54, %v1657_v55  ;;  %1365 = vpow2.f32 %v600_v53  ;;  %v606_v4 = vmul.f32 1.442695, %v592_v48 }
 0x2b8   : > { %v1663_v56 = vpop.xlane.xlu1 %551 }
 0x2b9   : > { %v608_v59 = vmul.f32 1.442695, %v593_v45  ;;  %v590_v61 = vsub.f32 %v1579_v52, %v1663_v56 }
 0x2ba   : > { %v1667_v46 = vpop.xlane.xlu0 %554 }
 0x2bb   : > { %v591_v62 = vsub.f32 %v1587_v57, %v1667_v46  ;;  %v602_v8 = vmul.f32 1.442695, %v590_v61  ;;  %1367 = vpow2.f32 %v608_v59 }
 0x2bc   : > { %v1360_v63 = vpop.eup %1359  ;;  %v818_v9 = vpop.xlane.xlu1 %817 }
 0x2bd   : > { %v604_v54 = vmul.f32 1.442695, %v591_v62  ;;  %v1672_v13 = vmax.f32 %v1643_v39, %v818_v9  ;;  %v624_v50 = vsel %vm537_vm2, %v1360_v63, 0.0  ;;  %1369 = vpow2.f32 %v602_v8 }
 0x2be   : > { %625 = vadd.xlane.f32.xlu1 %v624_v50 }
 0x2bf   : > { %1371 = vpow2.f32 %v604_v54  ;;  %v848_v52 = vsub.f32 %v1643_v39, %v1672_v13  ;;  %v872_v57 = vsub.f32 %v1601_v0, %v1672_v13 }
 0x2c0   : > { %v1362_v16 = vpop.eup %1361  ;;  %v824_v18 = vpop.xlane.xlu1 %823  ;;  %1373 = vpow2.f32 %v606_v4 }
 0x2c1   : > { %v821_v19 = vpop.xlane.xlu0 %820  ;;  %v880_v23 = vmul.f32 1.442695, %v872_v57  ;;  %v1682_v24 = vmax.f32 %v1639_v36, %v824_v18  ;;  %v618_v29 = vsel %vm537_vm2, %v1362_v16, 0.0 }
 0x2c2   : > { %v1685_v27 = vmax.f32 %v1647_v41, %v821_v19  ;;  %v1364_v28 = vpop.eup %1363  ;;  %619 = vadd.xlane.f32.xlu1 %v618_v29 }
 0x2c3   : > { %v850_v0 = vsub.f32 %v1639_v36, %v1682_v24  ;;  %v874_v30 = vsub.f32 %v1596_v60, %v1682_v24  ;;  %1375 = vpow2.f32 %v880_v23  ;;  %v650_v34 = vpack.c.bf16 %v1364_v28, %v1362_v16 }
 0x2c4   : > { %v849_v58 = vsub.f32 %v1647_v41, %v1685_v27  ;;  %v873_v31 = vsub.f32 %v1609_v15, %v1685_v27  ;;  %v830_v32 = vpop.xlane.xlu1 %829  ;;  %v1366_v37 = vpop.eup %1365 }
 0x2c5   : > { %v827_v33 = vpop.xlane.xlu0 %826  ;;  %v884_v38 = vmul.f32 1.442695, %v874_v30  ;;  %v1697_v42 = vmax.f32 %v1663_v56, %v830_v32  ;;  %1312 = vmatprep.mubr.msk.bf16.mxu1 %vm537_vm2, %v650_v34  ;;  %v627_v49 = vsel %vm537_vm2, %v1366_v37, 0.0  ;;  %v651_v43 = vpack.c.bf16 %v1366_v37, %v1360_v63 }
 0x2c6   : > { %v882_v44 = vmul.f32 1.442695, %v873_v31  ;;  %v1700_v60 = vmax.f32 %v1651_v47, %v827_v33  ;;  %628 = vadd.xlane.f32.xlu0 %v627_v49 }
 0x2c7   : > { %v852_v15 = vsub.f32 %v1663_v56, %v1697_v42  ;;  %1377 = vpow2.f32 %v884_v38  ;;  %1313 = vmatmul.mubr.msk.bf16.vlgmr.msra.gmra.mxu1 %vm537_vm2, %v651_v43  ;;  %v876_v61 = vsub.f32 %v1618_v22, %v1697_v42 }
 0x2c8   : > { %v851_v53 = vsub.f32 %v1651_v47, %v1700_v60  ;;  %v875_v45 = vsub.f32 %v1606_v12, %v1700_v60  ;;  %v836_v48 = vpop.xlane.xlu1 %835  ;;  %1333 = vmatpush3.bf16.msra.mxu1 %v1636_v35  ;;  %v1368_v63 = vpop.eup %1367  ;;  %1379 = vpow2.f32 %v882_v44  ;;  %v621_v12 = vsel %vm537_vm2, %v1364_v28, 0.0 }
 0x2c9   : > { %v833_v59 = vpop.xlane.xlu0 %832  ;;  %v1715_v62 = vmax.f32 %v1655_v51, %v836_v48  ;;  %1334 = vmatprep.subr.bf16.mxu1 %v445_v40  ;;  %v888_v17 = vmul.f32 1.442695, %v876_v61  ;;  %v864_v13 = vmul.f32 1.442695, %v852_v15 }
 0x2ca   : > { %v886_v4 = vmul.f32 1.442695, %v875_v45  ;;  %v1718_v8 = vmax.f32 %v1667_v46, %v833_v59  ;;  %v1370_v9 = vpop.eup %1369  ;;  %622 = vadd.xlane.f32.xlu0 %v621_v12  ;;  %v639_v45 = vsel %vm537_vm2, %v1368_v63, 0.0 }
 0x2cb   : > { %v854_v54 = vsub.f32 %v1655_v51, %v1715_v62  ;;  %v878_v22 = vsub.f32 %v1616_v20, %v1715_v62  ;;  %v630_v57 = vsel %vm537_vm2, %v1370_v9, 0.0 }
 0x2cc   : > { %v1372_v35 = vpop.eup %1371  ;;  %v853_v50 = vsub.f32 %v1667_v46, %v1718_v8  ;;  %v877_v14 = vsub.f32 %v1626_v26, %v1718_v8  ;;  %1335 = vmatpush3.bf16.msra.mxu1 %v445_v40  ;;  %631 = vadd.xlane.f32.xlu1 %v630_v57  ;;  %1381 = vpow2.f32 %v886_v4 }
 0x2cd   : > { %v839_v16 = vpop.xlane.xlu0 %838  ;;  %v892_v18 = vmul.f32 1.442695, %v878_v22  ;;  %v1374_v21 = vpop.eup %1373  ;;  %v652_v23 = vpack.c.bf16 %v1372_v35, %v1370_v9  ;;  %v633_v30 = vsel %vm537_vm2, %v1372_v35, 0.0 }
 0x2ce   : > { %v1731_v19 = vmax.f32 %v1657_v55, %v839_v16  ;;  %v890_v20 = vmul.f32 1.442695, %v877_v14  ;;  %v653_v29 = vpack.c.bf16 %v1368_v63, %v1374_v21  ;;  %v636_v40 = vsel %vm537_vm2, %v1374_v21, 0.0 }
 0x2cf   : > { %1383 = vpow2.f32 %v892_v18  ;;  %1316 = vmatprep.mubr.msk.bf16.mxu1 %vm537_vm2, %v652_v23  ;;  %v564_v16 = vsub.f32 -inf, %v1639_v36  ;;  %v562_v18 = vsub.f32 -inf, %v1643_v39  ;;  %v860_v23 = vmul.f32 1.442695, %v850_v0 }
 0x2d0   : > { %v855_v28 = vsub.f32 %v1657_v55, %v1731_v19  ;;  %v879_v26 = vsub.f32 %v1624_v25, %v1731_v19  ;;  %v1376_v31 = vpop.eup %1375  ;;  %1385 = vpow2.f32 %v888_v17  ;;  %1317 = vmatmul.mubr.msk.bf16.gmra.mxu1 %vm537_vm2, %v653_v29  ;;  %634 = vadd.xlane.f32.xlu1 %v633_v30  ;;  %v566_v30 = vsub.f32 -inf, %v1663_v56 }
 0x2d1   : > { %1387 = vpow2.f32 %v890_v20  ;;  %v904_v33 = vsel %vm537_vm2, %v1376_v31, 0.0  ;;  %v574_v17 = vmul.f32 1.442695, %v564_v16  ;;  %v570_v21 = vmul.f32 1.442695, %v562_v18 }
 0x2d2   : > { %v894_v32 = vmul.f32 1.442695, %v879_v26  ;;  %v565_v20 = vsub.f32 -inf, %v1651_v47  ;;  %v563_v26 = vsub.f32 -inf, %v1647_v41  ;;  %v862_v36 = vmul.f32 1.442695, %v851_v53 }
 0x2d3   : > { %v568_v53 = vsub.f32 -inf, %v1655_v51  ;;  %v866_v27 = vmul.f32 1.442695, %v853_v50  ;;  %v870_v16 = vmul.f32 1.442695, %v855_v28 }
 0x2d4   : > { %1389 = vpow2.f32 %v894_v32  ;;  %v1378_v34 = vpop.eup %1377  ;;  %905 = vadd.xlane.f32.xlu1 %v904_v33  ;;  %v576_v29 = vmul.f32 1.442695, %v565_v20  ;;  %v572_v32 = vmul.f32 1.442695, %v563_v26  ;;  %v578_v33 = vmul.f32 1.442695, %v566_v30 }
 0x2d5   : > { %v910_v25 = vsel %vm537_vm2, %v1378_v34, 0.0  ;;  %v1380_v37 = vpop.eup %1379  ;;  %1391 = vpow2.f32 %v574_v17  ;;  %v582_v15 = vmul.f32 1.442695, %v568_v53 }
 0x2d6   : > { %911 = vadd.xlane.f32.xlu0 %v910_v25  ;;  %v944_v38 = vpack.c.bf16 %v1380_v37, %v1376_v31  ;;  %v907_v4 = vsel %vm537_vm2, %v1380_v37, 0.0  ;;  %1393 = vpow2.f32 %v570_v21  ;;  %v856_v31 = vmul.f32 1.442695, %v848_v52 }
 0x2d7   : > { %1395 = vpow2.f32 %v860_v23  ;;  %v858_v25 = vmul.f32 1.442695, %v849_v58 }
 0x2d8   : > { %637 = vadd.xlane.f32.xlu1 %v636_v40  ;;  %1336 = vmatprep.mubr.msk.bf16.mxu1 %vm537_vm2, %v944_v38  ;;  %1397 = vpow2.f32 %v576_v29  ;;  %v569_v38 = vsub.f32 -inf, %v1657_v55 }
 0x2d9   : > { %v1382_v44 = vpop.eup %1381  ;;  %1399 = vpow2.f32 %v856_v31 }
 0x2da   : > { %v913_v49 = vsel %vm537_vm2, %v1382_v44, 0.0  ;;  %v945_v43 = vpack.c.bf16 %v1382_v44, %v1378_v34  ;;  %v567_v34 = vsub.f32 -inf, %v1667_v46  ;;  %1401 = vpow2.f32 %v572_v32 }
 0x2db   : > { %914 = vadd.xlane.f32.xlu0 %v913_v49  ;;  %1403 = vpow2.f32 %v578_v33  ;;  %v868_v46 = vmul.f32 1.442695, %v854_v54 }
 0x2dc   : > { %v1384_v48 = vpop.eup %1383  ;;  %640 = vadd.xlane.f32.xlu1 %v639_v45  ;;  %1337 = vmatmul.mubr.msk.bf16.vlgmr.msra.gmra.mxu1 %vm537_vm2, %v945_v43  ;;  %v580_v0 = vmul.f32 1.442695, %v567_v34  ;;  %1405 = vpow2.f32 %v862_v36 }
 0x2dd   : > { %v1386_v59 = vpop.eup %1385  ;;  %v922_v9 = vsel %vm537_vm2, %v1384_v48, 0.0 }
 0x2de   : > { %v1388_v61 = vpop.eup %1387  ;;  %v916_v63 = vsel %vm537_vm2, %v1386_v59, 0.0  ;;  %1407 = vpow2.f32 %v580_v0 }
 0x2df   : > { %v946_v12 = vpack.c.bf16 %v1388_v61, %v1386_v59  ;;  %908 = vadd.xlane.f32.xlu0 %v907_v4  ;;  %v919_v14 = vsel %vm537_vm2, %v1388_v61, 0.0  ;;  %1409 = vpow2.f32 %v858_v25  ;;  %v584_v61 = vmul.f32 1.442695, %v569_v38 }
 0x2e0   : > { %923 = vadd.xlane.f32.xlu1 %v922_v9  ;;  %1411 = vpow2.f32 %v864_v13 }
 0x2e1   : > { %v1390_v22 = vpop.eup %1389  ;;  %1340 = vmatprep.mubr.msk.bf16.mxu1 %vm537_vm2, %v946_v12  ;;  %1413 = vpow2.f32 %v866_v27 }
 0x2e2   : > { %v947_v35 = vpack.c.bf16 %v1390_v22, %v1384_v48  ;;  %v925_v57 = vsel %vm537_vm2, %v1390_v22, 0.0  ;;  %v1392_v24 = vpop.eup %1391  ;;  %1415 = vpow2.f32 %v582_v15 }
 0x2e3   : > { %917 = vadd.xlane.f32.xlu0 %v916_v63  ;;  %v1772_v39 = vmul.f32 0.0, %v1392_v24  ;;  %v1394_v37 = vpop.eup %1393  ;;  %1417 = vpow2.f32 %v584_v61 }
 0x2e4   : > { %1341 = vmatmul.mubr.msk.bf16.gmra.mxu1 %vm537_vm2, %v947_v35  ;;  %v1778_v60 = vpop.eup %1395  ;;  %v610_v56 = vmul.f32 0.0, %v1394_v37  ;;  %1419 = vpow2.f32 %v868_v46 }
 0x2e5   : > { %v1398_v58 = vpop.eup %1397  ;;  %1421 = vpow2.f32 %v870_v16 }
 0x2e6   : > { %v1400_v44 = vpop.eup %1399  ;;  %v613_v49 = vmul.f32 0.0, %v1398_v58 }
 0x2e7   : > { %920 = vadd.xlane.f32.xlu0 %v919_v14  ;;  %v1402_v45 = vpop.eup %1401 }
 0x2e8   : > { %v1404_v59 = vpop.eup %1403  ;;  %v611_v8 = vmul.f32 0.0, %v1402_v45 }
 0x2e9   : > { %v1406_v12 = vpop.eup %1405  ;;  %v614_v63 = vmul.f32 0.0, %v1404_v59 }
 0x2eb   : > { %926 = vadd.xlane.f32.xlu0 %v925_v57  ;;  %v1408_v22 = vpop.eup %1407 }
 0x2ec   : > { %v1410_v14 = vpop.eup %1409  ;;  %v615_v20 = vmul.f32 0.0, %v1408_v22 }
 0x2ed   : > { %v1412_v21 = vpop.eup %1411 }
 0x2ee   : > { %v1414_v23 = vpop.eup %1413 }
 0x2ef   : > { %v1416_v29 = vpop.eup %1415 }
 0x2f0   : > { %v616_v31 = vmul.f32 0.0, %v1416_v29  ;;  %v1418_v32 = vpop.eup %1417 }
 0x2f1   : > { %v1420_v36 = vpop.eup %1419  ;;  %v617_v24 = vmul.f32 0.0, %v1418_v32 }
 0x2f2   : > { %v1422_v0 = vpop.eup %1421 }
 0x347   : > { %v626_v52 = vpop.xlane.xlu1 %625 }
 0x348   : > { %v644_v47 = vadd.f32 %v626_v52, %v1772_v39 }
 0x34a   : > { %v1782_v41 = vmul.f32 %v1778_v60, %v644_v47 }
 0x34b   : > { %v620_v42 = vpop.xlane.xlu1 %619 }
 0x34c   : > { %v642_v40 = vadd.f32 %v620_v42, %v610_v56 }
 0x34e   : > { %v896_v43 = vmul.f32 %v1400_v44, %v642_v40 }
 0x34f   : > { %v629_v48 = vpop.xlane.xlu0 %628 }
 0x350   : > { %v645_v4 = vadd.f32 %v629_v48, %v613_v49 }
 0x352   : > { %v899_v50 = vmul.f32 %v1406_v12, %v645_v4 }
 0x353   : > { %v623_v9 = vpop.xlane.xlu0 %622 }
 0x354   : > { %v643_v35 = vadd.f32 %v623_v9, %v611_v8 }
 0x355   : > { %v632_v57 = vpop.xlane.xlu1 %631 }
 0x356   : > { %v646_v17 = vadd.f32 %v632_v57, %v614_v63  ;;  %v897_v18 = vmul.f32 %v1410_v14, %v643_v35 }
 0x358   : > { %v900_v51 = vmul.f32 %v1412_v21, %v646_v17 }
 0x359   : > { %v635_v62 = vpop.xlane.xlu1 %634 }
 0x35a   : > { %v647_v54 = vadd.f32 %v635_v62, %v615_v20 }
 0x35c   : > { %v901_v26 = vmul.f32 %v1414_v23, %v647_v54 }
 0x35d   : > { %v906_v30 = vpop.xlane.xlu1 %905 }
 0x35e   : > { %v928_v46 = vadd.f32 %v906_v30, %v896_v43 }
 0x35f   : > { %v912_v13 = vpop.xlane.xlu0 %911 }
 0x360   : > { %v930_v59 = vadd.f32 %v912_v13, %v1782_v41 }
 0x361   : > { %v638_v33 = vpop.xlane.xlu1 %637 }
 0x362   : > { %v648_v34 = vadd.f32 %v638_v33, %v616_v31  ;;  %1423 = vrcp.f32 %v930_v59 }
 0x363   : > { %1425 = vrcp.f32 %v928_v46 }
 0x364   : > { %v902_v55 = vmul.f32 %v1420_v36, %v648_v34  ;;  %v915_v52 = vpop.xlane.xlu0 %914 }
 0x365   : > { %v641_v19 = vpop.xlane.xlu1 %640 }
 0x366   : > { %v649_v28 = vadd.f32 %v641_v19, %v617_v24 }
 0x368   : > { %v903_v25 = vmul.f32 %v1422_v0, %v649_v28  ;;  %v909_v37 = vpop.xlane.xlu0 %908 }
 0x369   : > { %v924_v62 = vpop.xlane.xlu1 %923 }
 0x36c   : > { %v918_v15 = vpop.xlane.xlu0 %917 }
 0x36f   : > { %v1424_v32 = vpop.eup %1423 }
 0x370   : > { %v921_v35 = vpop.xlane.xlu0 %920 }
 0x387   : > { %v1314_v47 = vpop.f32.mrf.mxu1 }
 0x388   : > { %v733_v53 = vadd.f32 %v1314_v47, %v1772_v39  ;;  %v931_v39 = vadd.f32 %v915_v52, %v899_v50  ;;  %v933_v50 = vadd.f32 %v921_v35, %v901_v26 }
 0x389   : > { %v700_v27 = vpop.f32.mrf.mxu1 }
 0x38a   : > { %v731_v58 = vadd.f32 %v700_v27, %v610_v56  ;;  %v938_v42 = vmul.f32 %v1778_v60, %v733_v53  ;;  %v929_v60 = vadd.f32 %v909_v37, %v897_v18  ;;  %1427 = vrcp.f32 %v931_v39 }
 0x38b   : > { %v1315_v38 = vpop.f32.mrf.mxu1 }
 0x38c   : > { %v734_v40 = vadd.f32 %v1315_v38, %v613_v49  ;;  %v936_v45 = vmul.f32 %v1400_v44, %v731_v58  ;;  %1429 = vrcp.f32 %v929_v60 }
 0x38d   : > { %v703_v48 = vpop.f32.mrf.mxu1 }
 0x38e   : > { %v732_v61 = vadd.f32 %v703_v48, %v611_v8  ;;  %v939_v4 = vmul.f32 %v1406_v12, %v734_v40  ;;  %v934_v8 = vadd.f32 %v924_v62, %v902_v55  ;;  %v927_v12 = vpop.xlane.xlu0 %926 }
 0x390   : > { %v1318_v9 = vpop.f32.mrf.mxu1  ;;  %v937_v22 = vmul.f32 %v1410_v14, %v732_v61  ;;  %v932_v14 = vadd.f32 %v918_v15, %v900_v51  ;;  %1431 = vrcp.f32 %v934_v8  ;;  %v1050_v51 = vstv %s1049_s13 }
 0x391   : > { %v737_v57 = vadd.f32 %v1318_v9, %v616_v31  ;;  %v935_v31 = vadd.f32 %v927_v12, %v903_v25 }
 0x392   : > { %v716_v16 = vpop.f32.mrf.mxu1  ;;  %1433 = vrcp.f32 %v932_v14 }
 0x393   : > { %v735_v56 = vadd.f32 %v716_v16, %v614_v63  ;;  %v942_v17 = vmul.f32 %v1420_v36, %v737_v57  ;;  %1435 = vrcp.f32 %v935_v31  ;;  %v1426_v36 = vpop.eup %1425 }
 0x394   : > { %v1319_v49 = vpop.f32.mrf.mxu1  ;;  %1437 = vrcp.f32 %v933_v50 }
 0x395   : > { %v738_v44 = vadd.f32 %v1319_v49, %v617_v24  ;;  %v940_v54 = vmul.f32 %v1412_v21, %v735_v56 }
 0x396   : > { %v719_v41 = vpop.f32.mrf.mxu1 }
 0x397   : > { %v736_v43 = vadd.f32 %v719_v41, %v615_v20  ;;  %v943_v29 = vmul.f32 %v1422_v0, %v738_v44  ;;  %v1428_v19 = vpop.eup %1427 }
 0x399   : > { %v941_v30 = vmul.f32 %v1414_v23, %v736_v43  ;;  %v1430_v13 = vpop.eup %1429 }
 0x39c   : > { %v1338_v63 = vpop.f32.mrf.mxu1 }
 0x39d   : > { %v1027_v18 = vadd.f32 %v1338_v63, %v938_v42  ;;  %v1432_v42 = vpop.eup %1431 }
 0x39e   : > { %v994_v33 = vpop.f32.mrf.mxu1 }
 0x39f   : > { %v1043_v21 = vmul.f32 %v1424_v32, %v1027_v18  ;;  %v1025_v34 = vadd.f32 %v994_v33, %v936_v45  ;;  %v1434_v40 = vpop.eup %1433 }
 0x3a0   : > { %v1339_v24 = vpop.f32.mrf.mxu1  ;;  %v1436_v9 = vpop.eup %1435 }
 0x3a1   : > { %v1041_v20 = vmul.f32 %v1426_v36, %v1025_v34  ;;  %v1028_v55 = vadd.f32 %v1339_v24, %v939_v4  ;;  %v1053_v52 = vmul.f32 %v1050_v51, %v1043_v21 }
 0x3a2   : > { %v997_v23 = vpop.f32.mrf.mxu1 }
 0x3a3   : > { %v1051_v28 = vmul.f32 %v1050_v51, %v1041_v20  ;;  %v1044_v0 = vmul.f32 %v1428_v19, %v1028_v55  ;;  %v1026_v25 = vadd.f32 %v997_v23, %v937_v22  ;;  %v1061_v59 = vadd.f32 %v1053_v52, %v1511_v3 }
 0x3a4   : > { %v1342_v26 = vpop.f32.mrf.mxu1 }
 0x3a5   : > { %v1042_v37 = vmul.f32 %v1430_v13, %v1026_v25  ;;  %v1059_v47 = vadd.f32 %v1051_v28, %v1507_v1  ;;  %v1054_v53 = vmul.f32 %v1050_v51, %v1044_v0  ;;  %v1031_v27 = vadd.f32 %v1342_v26, %v942_v17  ;;  %v1438_v17 = vpop.eup %1437 }
 0x3a6   : > { %v1010_v58 = vpop.f32.mrf.mxu1  ;;  %v1070_v62 = vsel %vm281_vm0, %v1061_v59, 0.0 }
 0x3a7   : > { %v1052_v15 = vmul.f32 %v1050_v51, %v1042_v37  ;;  %v1029_v38 = vadd.f32 %v1010_v58, %v940_v54  ;;  %v1047_v45 = vmul.f32 %v1432_v42, %v1031_v27  ;;  %v1067_v22 = vsel %vm281_vm0, %v1059_v47, 0.0 }
 0x3a8   : > { %v1343_v48 = vpop.f32.mrf.mxu1  ;;  %v1062_v1 = vadd.f32 %v1054_v53, %v1515_v5 }
 0x3a9   : > { %v1060_v61 = vadd.f32 %v1052_v15, %v1509_v2  ;;  %v1045_v4 = vmul.f32 %v1434_v40, %v1029_v38  ;;  %v1032_v46 = vadd.f32 %v1343_v48, %v943_v29  ;;  %v1057_v3 = vmul.f32 %v1050_v51, %v1047_v45 }
 0x3aa   : > { %v1013_v35 = vpop.f32.mrf.mxu1  ;;  %v1072_v54 = vsel %vm281_vm0, %v1062_v1, 0.0 }
 0x3ab   : > { %v1068_v57 = vsel %vm281_vm0, %v1060_v61, 0.0  ;;  %v1055_v39 = vmul.f32 %v1050_v51, %v1045_v4  ;;  %v1048_v16 = vmul.f32 %v1436_v9, %v1032_v46  ;;  %v1030_v56 = vadd.f32 %v1013_v35, %v941_v30 }
 0x3ac   : > { %v1069_v60 = vadd.f32 %v1068_v57, %v1067_v22  ;;  %v1065_v12 = vadd.f32 %v1057_v3, %v1529_v10 }
 0x3ad   : > { %v1063_v2 = vadd.f32 %v1055_v39, %v1517_v6  ;;  %v1046_v49 = vmul.f32 %v1438_v17, %v1030_v56  ;;  %v1058_v41 = vmul.f32 %v1050_v51, %v1048_v16 }
 0x3ae   : > { %v1071_v44 = vadd.f32 %v1070_v62, %v1069_v60  ;;  %v1078_v6 = vsel %vm281_vm0, %v1065_v12, 0.0 }
 0x3af   : > { %v1056_v8 = vmul.f32 %v1050_v51, %v1046_v49  ;;  %v1074_v43 = vsel %vm281_vm0, %v1063_v2, 0.0  ;;  %v1066_v30 = vadd.f32 %v1058_v41, %v1531_v11 }
 0x3b0   : > { %v1073_v5 = vadd.f32 %v1072_v54, %v1071_v44 }
 0x3b1   : > { %v1064_v29 = vadd.f32 %v1056_v8, %v1519_v7  ;;  %v1080_v18 = vsel %vm281_vm0, %v1066_v30, 0.0 }
 0x3b2   : > { %v1075_v14 = vadd.f32 %v1074_v43, %v1073_v5 }
 0x3b3   : > { %v1076_v31 = vsel %vm281_vm0, %v1064_v29, 0.0 }
 0x3b4   : > { %v1077_v50 = vadd.f32 %v1076_v31, %v1075_v14 }
 0x3b6   : > { %v1079_v63 = vadd.f32 %v1078_v6, %v1077_v50 }
 0x3b8   : > { %v1081_v32 = vadd.f32 %v1080_v18, %v1079_v63 }
 0x3ba   : > { %v1082_v33 = vrot.slane %v1081_v32, 4 }
 0x3bc   : > { %v1083_v21 = vadd.f32 %v1082_v33, %v1081_v32 }
 0x3be   : > { %v1084_v34 = vrot.slane %v1083_v21, 2 }
 0x3c0   : > { %v1085_v10 = vadd.f32 %v1084_v34, %v1083_v21 }
 0x3c2   : > { %v1086_v36 = vrot.slane %v1085_v10, 1 }
 0x3c4   : > { %v1087_v24 = vadd.f32 %v1086_v36, %v1085_v10 }
 0x3c6   : > { %v1089_v20 = vmul.f32 0.015625, %v1087_v24 }
 0x3c8   : > { %v1090_v7 = vsub.f32 %v1059_v47, %v1089_v20  ;;  %v1091_v55 = vsub.f32 %v1060_v61, %v1089_v20  ;;  %v1092_v19 = vsub.f32 %v1061_v59, %v1089_v20  ;;  %v1093_v11 = vsub.f32 %v1062_v1, %v1089_v20 }
 0x3c9   : > { %v1094_v51 = vsub.f32 %v1063_v2, %v1089_v20  ;;  %v1095_v23 = vsub.f32 %v1064_v29, %v1089_v20  ;;  %v1096_v28 = vsub.f32 %v1065_v12, %v1089_v20  ;;  %v1097_v0 = vsub.f32 %v1066_v30, %v1089_v20 }
 0x3ca   : > { %v1098_v25 = vmul.f32 %v1090_v7, %v1090_v7  ;;  %v1099_v13 = vmul.f32 %v1091_v55, %v1091_v55  ;;  %v1100_v26 = vmul.f32 %v1092_v19, %v1092_v19  ;;  %v1101_v52 = vmul.f32 %v1093_v11, %v1093_v11 }
 0x3cb   : > { %v1102_v58 = vmul.f32 %v1094_v51, %v1094_v51  ;;  %v1103_v15 = vmul.f32 %v1095_v23, %v1095_v23  ;;  %v1104_v45 = vmul.f32 %v1096_v28, %v1096_v28  ;;  %v1105_v61 = vmul.f32 %v1097_v0, %v1097_v0 }
 0x3cc   : > { %v1106_v37 = vsel %vm281_vm0, %v1098_v25, 0.0  ;;  %v1107_v53 = vsel %vm281_vm0, %v1099_v13, 0.0  ;;  %v1109_v42 = vsel %vm281_vm0, %v1100_v26, 0.0  ;;  %v1111_v38 = vsel %vm281_vm0, %v1101_v52, 0.0 }
 0x3cd   : > { %v1108_v27 = vadd.f32 %v1107_v53, %v1106_v37  ;;  %v1113_v48 = vsel %vm281_vm0, %v1102_v58, 0.0  ;;  %v1115_v4 = vsel %vm281_vm0, %v1103_v15, 0.0  ;;  %v1117_v9 = vsel %vm281_vm0, %v1104_v45, 0.0 }
 0x3ce   : > { %v1119_v1 = vsel %vm281_vm0, %v1105_v61, 0.0 }
 0x3cf   : > { %v1110_v47 = vadd.f32 %v1109_v42, %v1108_v27 }
 0x3d1   : > { %v1112_v40 = vadd.f32 %v1111_v38, %v1110_v47 }
 0x3d3   : > { %v1114_v59 = vadd.f32 %v1113_v48, %v1112_v40 }
 0x3d5   : > { %v1116_v46 = vadd.f32 %v1115_v4, %v1114_v59 }
 0x3d7   : > { %v1118_v22 = vadd.f32 %v1117_v9, %v1116_v46 }
 0x3d9   : > { %v1120_v35 = vadd.f32 %v1119_v1, %v1118_v22 }
 0x3db   : > { %v1121_v57 = vrot.slane %v1120_v35, 4 }
 0x3dd   : > { %v1122_v39 = vadd.f32 %v1121_v57, %v1120_v35 }
 0x3df   : > { %v1123_v16 = vrot.slane %v1122_v39, 2 }
 0x3e1   : > { %v1124_v56 = vadd.f32 %v1123_v16, %v1122_v39 }
 0x3e3   : > { %v1125_v17 = vrot.slane %v1124_v56, 1 }
 0x3e5   : > { %v1126_v60 = vadd.f32 %v1125_v17, %v1124_v56 }
 0x3e7   : > { %v1127_v62 = vmul.f32 0.015625, %v1126_v60 }
 0x3e9   : > { %v1128_v3 = vadd.f32 1e-05, %v1127_v62 }
 0x3eb   : > { %1439 = vrsqrt.f32 %v1128_v3 }
 0x3f8   : > { %v1440_v2 = vpop.eup %1439 }
 0x3f9   : > { %v1130_v49 = vmul.f32 %v1440_v2, %v1090_v7  ;;  %v1131_v44 = vmul.f32 %v1440_v2, %v1091_v55  ;;  %v1132_v54 = vmul.f32 %v1440_v2, %v1092_v19  ;;  %v1133_v41 = vmul.f32 %v1440_v2, %v1093_v11 }
 0x3fa   : > { %v1134_v8 = vmul.f32 %v1440_v2, %v1094_v51  ;;  %v1135_v5 = vmul.f32 %v1440_v2, %v1095_v23  ;;  %v1136_v12 = vmul.f32 %v1440_v2, %v1096_v28  ;;  %v1137_v43 = vmul.f32 %v1440_v2, %v1097_v0 }
 0x3fb   : > { %1138 = vst.msk [vmem:[%s252_s16] sm:$0xff] %vm281_vm0, %v1130_v49  ;;  %1139 = vst.msk [vmem:[%s252_s16 + $0x8] sm:$0xff] %vm281_vm0, %v1131_v44 }
 0x3fc   : > { %1140 = vst.msk [vmem:[%s252_s16 + $0x10] sm:$0xff] %vm281_vm0, %v1132_v54  ;;  %1141 = vst.msk [vmem:[%s252_s16 + $0x18] sm:$0xff] %vm281_vm0, %v1133_v41 }
 0x3fd   : > { %1142 = vst.msk [vmem:[%s252_s16 + $0x20] sm:$0xff] %vm281_vm0, %v1134_v8  ;;  %1143 = vst.msk [vmem:[%s252_s16 + $0x28] sm:$0xff] %vm281_vm0, %v1135_v5 }
 0x3fe   : > { %1144 = vst.msk [vmem:[%s252_s16 + $0x30] sm:$0xff] %vm281_vm0, %v1136_v12  ;;  %1145 = vst.msk [vmem:[%s252_s16 + $0x38] sm:$0xff] %vm281_vm0, %v1137_v43 }
 0x3ff PF: > { %s17_s23 = sadd.s32 1, %s1447_s23  }
 0x400   : > { %p14_p4 = scmp.ge.s32.totalorder %s17_s23, 4  }
 0x402   :  { %16 = sbr.rel (!%p14_p4) target bundleno = 2 (0x2), region = 74 }

</bundles_post_ra>
